<compile_context>
chip_gen: v7x
topology: tpu7x:2x2x1
jax: 0.10.0
libtpu: 0.0.40
codegen_flags: <defaults>
</compile_context>

<pallas_src>
import functools
import math

import jax
import jax.numpy as jnp
from jax import lax
from jax.experimental import pallas as pl
from jax.experimental.pallas import tpu as pltpu


# ---------------------------------------------------------------------------
# Pallas kernel: fused (conv0 ++ conv1 + crop + concat) for Nb images / step
# ---------------------------------------------------------------------------
def _fused_conv_concat_kernel(x_ref, w_ref, b_ref, o_ref, xpad_ref, *,
                              img_w, kh, kw):
    """One grid step: Nb images of the fused VALID 3x3 conv.

    x_ref   : (Nb, Cin, H*W)      f32   flattened input images (read once)
    w_ref   : (kh*kw, Cout, Cin)  bf16  fused per-tap weights (resident)
    b_ref   : (Cout, 1)           f32   fused bias (resident)
    o_ref   : (Nb, Cout, H*W)           lane-dense output (halo sliced outside)
    xpad_ref: (Cin, H*W + PAD)    bf16  scratch: lane-extended image so every
                                        tap slice [s, s+H*W) stays in range
    """
    nb, _, hw = x_ref.shape
    cout = o_ref.shape[1]
    bias = b_ref[...]                                     # (Cout, 1) f32

    # Zero the lane extension; it only feeds output lanes in the discarded
    # halo, but keep them finite.
    xpad_ref[:, hw:] = jnp.zeros(
        (xpad_ref.shape[0], xpad_ref.shape[1] - hw), xpad_ref.dtype)

    for b in range(nb):                                   # static unroll
        # Read the image once from the block, cast to bf16 for the MXU.
        xpad_ref[:, :hw] = x_ref[b].astype(xpad_ref.dtype)

        acc = jnp.zeros((cout, hw), jnp.float32)
        for dh in range(kh):
            for dw in range(kw):
                s = dh * img_w + dw                       # tap == lane offset
                xs = xpad_ref[:, s:s + hw]                # (Cin, H*W) bf16
                acc += jnp.dot(w_ref[dh * kw + dw], xs,
                               preferred_element_type=jnp.float32)

        o_ref[b] = (acc + bias).astype(o_ref.dtype)       # dense 256-lane store


# ---------------------------------------------------------------------------
# Wrapper
# ---------------------------------------------------------------------------
def concat_forward(x, params, dim=1, *, block_n=8, out_dtype=jnp.float32,
                   mxu_dtype=jnp.bfloat16):
    """Forward pass of Concat(dim=1, conv3x3(pad=1), conv3x3(pad=0))."""
    # TODO(synk): generic Concat over arbitrary child modules is specialized
    # here to the two 3x3-conv-branch instantiation.
    assert dim == 1, "this synthetic instantiation concatenates over channels"
    (w0, b0), (w1, b1) = params
    N, Cin, H, W = x.shape
    C0, C1 = w0.shape[0], w1.shape[0]
    kh, kw = w0.shape[2], w0.shape[3]
    # Fusion validity: branch0 is k=3/pad=1 (SAME, later center-cropped by 1)
    # and branch1 is k=3/pad=0 (VALID) -> identical receptive fields.
    assert (kh, kw) == (3, 3) and tuple(w1.shape[2:]) == (3, 3)
    assert w0.shape[1] == Cin and w1.shape[1] == Cin

    Ht, Wt = H - kh + 1, W - kw + 1          # min spatial shape (14, 14)
    Cout = C0 + C1                           # 10
    HW = H * W                               # 256 -> dense lane axis
    KK = kh * kw                             # 9 taps

    # Images per grid step (amortizes the ~600-cycle per-step overhead).
    Nb = math.gcd(N, block_n)
    grid = (N // Nb,)

    # Lane extension so every tap slice stays in range; round to 128 lanes.
    s_max = (kh - 1) * W + (kw - 1)
    pad = -(-s_max // 128) * 128

    # Free row-major flatten; no im2col blow-up, no transposes.
    x_flat = x.reshape(N, Cin, HW)

    # Fused weights/bias: concatenating along Cout realizes the channel
    # concat of the module for free; reorder to (tap, Cout, Cin).
    wf = (jnp.concatenate([w0, w1], axis=0)
          .transpose(2, 3, 0, 1).reshape(KK, Cout, Cin).astype(mxu_dtype))
    bf = jnp.concatenate([b0, b1], axis=0).reshape(Cout, 1).astype(jnp.float32)

    kernel = functools.partial(_fused_conv_concat_kernel,
                               img_w=W, kh=kh, kw=kw)

    cost = pl.CostEstimate(
        flops=2 * N * Cout * Cin * KK * HW,
        transcendentals=0,
        bytes_accessed=(x_flat.size * x_flat.dtype.itemsize
                        + wf.size * wf.dtype.itemsize
                        + bf.size * 4
                        + N * Cout * HW * jnp.dtype(out_dtype).itemsize),
    )

    out = pl.pallas_call(
        kernel,
        out_shape=jax.ShapeDtypeStruct((N, Cout, HW), out_dtype),
        grid=grid,
        in_specs=[
            pl.BlockSpec((Nb, Cin, HW), lambda i: (i, 0, 0)),     # x (read once)
            pl.BlockSpec((KK, Cout, Cin), lambda i: (0, 0, 0)),   # fused weights
            pl.BlockSpec((Cout, 1), lambda i: (0, 0)),            # fused bias
        ],
        out_specs=pl.BlockSpec((Nb, Cout, HW), lambda i: (i, 0, 0)),
        scratch_shapes=[pltpu.VMEM((Cin, HW + pad), mxu_dtype)],
        compiler_params=pltpu.CompilerParams(
            # Megacore sharding over batch blocks (only pays off once the
            # grid has several steps per core; harmless at toy sizes).
            dimension_semantics=("parallel",),
        ),
        cost_estimate=cost,
    )(x_flat, wf, bf)

    # (N, Cout, H*W) -> (N, Cout, H, W); drop the (kh-1, kw-1) halo of
    # garbage lanes -> (N, C0+C1, Ht, Wt).
    return out.reshape(N, Cout, H, W)[:, :, :Ht, :Wt]


# ---------------------------------------------------------------------------
# Reference (plain JAX) — mirrors the PyTorch module exactly
# ---------------------------------------------------------------------------
def _ref_forward(x, params):
    (w0, b0), (w1, b1) = params
    dn = ("NCHW", "OIHW", "NCHW")
    y0 = lax.conv_general_dilated(x, w0, (1, 1), [(1, 1), (1, 1)],
                                  dimension_numbers=dn,
                                  precision=lax.Precision.HIGHEST)
    y0 = y0 + b0[None, :, None, None]
    y1 = lax.conv_general_dilated(x, w1, (1, 1), [(0, 0), (0, 0)],
                                  dimension_numbers=dn,
                                  precision=lax.Precision.HIGHEST)
    y1 = y1 + b1[None, :, None, None]
    Ht = min(y0.shape[2], y1.shape[2])
    Wt = min(y0.shape[3], y1.shape[3])
    crops = []
    for y in (y0, y1):
        d2 = (y.shape[2] - Ht) // 2
        d3 = (y.shape[3] - Wt) // 2
        crops.append(y[:, :, d2:d2 + Ht, d3:d3 + Wt])
    return jnp.concatenate(crops, axis=1)


# ---------------------------------------------------------------------------
# Main
# ---------------------------------------------------------------------------
if __name__ == "__main__":
    key = jax.random.PRNGKey(0)
    k_x, k_w0, k_b0, k_w1, k_b1 = jax.random.split(key, 5)

    N, Cin, H, W = 2, 4, 16, 16
    C0, C1 = 6, 4

    x = jax.random.normal(k_x, (N, Cin, H, W), dtype=jnp.float32)
    w0 = jax.random.normal(k_w0, (C0, Cin, 3, 3), dtype=jnp.float32) * 0.1
    b0 = jax.random.normal(k_b0, (C0,), dtype=jnp.float32) * 0.1
    w1 = jax.random.normal(k_w1, (C1, Cin, 3, 3), dtype=jnp.float32) * 0.1
    b1 = jax.random.normal(k_b1, (C1,), dtype=jnp.float32) * 0.1
    params = ((w0, b0), (w1, b1))

    fwd = jax.jit(lambda xx, pp: concat_forward(xx, pp, dim=1))
    out = jax.block_until_ready(fwd(x, params))
    assert out.shape == (N, C0 + C1, H - 2, W - 2), out.shape

    # Strict check: reference computed with the same bf16-rounded MXU operands
    # (f32 accumulate / f32 bias) — isolates kernel correctness from the
    # deliberate bf16 operand choice.
    rd = lambda a: a.astype(jnp.bfloat16).astype(jnp.float32)
    params_bf = tuple((rd(w), b) for (w, b) in params)
    ref_bf = _ref_forward(rd(x), params_bf)
    assert jnp.allclose(out, ref_bf, atol=1e-3, rtol=1e-3), "kernel mismatch"

    # Sanity check vs the full-f32 reference (only bf16 operand rounding diff).
    ref_f32 = _ref_forward(x, params)
    assert jnp.allclose(out, ref_f32, atol=5e-2, rtol=5e-2), "f32 drift too big"

    print("KERNEL_OK")
</pallas_src>

<mosaic_0001>
module attributes {stable_mosaic.version = 11 : i64} {
  func.func @_fused_conv_concat_kernel(%arg0: i32, %arg1: memref<2x4x256xf32, #tpu.memory_space<vmem>>, %arg2: memref<9x10x4xbf16, #tpu.memory_space<vmem>>, %arg3: memref<10x1xf32, #tpu.memory_space<vmem>>, %arg4: memref<2x10x256xf32, #tpu.memory_space<vmem>>, %arg5: memref<4x384xbf16, #tpu.memory_space<vmem>>) attributes {dimension_semantics = [#tpu.dimension_semantics<parallel>], iteration_bounds = array<i64: 1>, scalar_prefetch = 0 : i64, scratch_operands = 1 : i64, tpu.core_type = #tpu.core_type<tc>, window_params = [{transform_indices = @transform_0, window_bounds = array<i64: 2, 4, 256>}, {pipeline_mode = #tpu.pipeline_mode<synchronous>, transform_indices = @transform_1, window_bounds = array<i64: 9, 10, 4>}, {pipeline_mode = #tpu.pipeline_mode<synchronous>, transform_indices = @transform_2, window_bounds = array<i64: 10, 1>}, {transform_indices = @transform_3, window_bounds = array<i64: 2, 10, 256>}]} {
    %c0 = arith.constant 0 : index
    %c0_0 = arith.constant 0 : index
    %0 = vector.load %arg3[%c0, %c0_0] : memref<10x1xf32, #tpu.memory_space<vmem>>, vector<10x1xf32>
    %cst = arith.constant 0.000000e+00 : bf16
    %1 = vector.broadcast %cst : bf16 to vector<4x128xbf16>
    %c0_1 = arith.constant 0 : index
    %c256 = arith.constant 256 : index
    %2 = vector.load %arg5[%c0_1, %c256] : memref<4x384xbf16, #tpu.memory_space<vmem>>, vector<4x128xbf16>
    tpu.vector_store %arg5[%c0_1, %c256], %1 {strides = array<i32>} : memref<4x384xbf16, #tpu.memory_space<vmem>>, vector<4x128xbf16>,
    %c0_2 = arith.constant 0 : index
    %c0_3 = arith.constant 0 : index
    %c0_4 = arith.constant 0 : index
    %3 = vector.load %arg1[%c0_2, %c0_3, %c0_4] : memref<2x4x256xf32, #tpu.memory_space<vmem>>, vector<1x4x256xf32>
    %4 = vector.shape_cast %3 : vector<1x4x256xf32> to vector<4x256xf32>
    %5 = arith.truncf %4 : vector<4x256xf32> to vector<4x256xbf16>
    %c0_5 = arith.constant 0 : index
    %c0_6 = arith.constant 0 : index
    %6 = vector.load %arg5[%c0_5, %c0_6] : memref<4x384xbf16, #tpu.memory_space<vmem>>, vector<4x256xbf16>
    tpu.vector_store %arg5[%c0_5, %c0_6], %5 {strides = array<i32>} : memref<4x384xbf16, #tpu.memory_space<vmem>>, vector<4x256xbf16>,
    %cst_7 = arith.constant 0.000000e+00 : f32
    %7 = vector.broadcast %cst_7 : f32 to vector<10x256xf32>
    %c0_8 = arith.constant 0 : index
    %c0_9 = arith.constant 0 : index
    %8 = vector.load %arg5[%c0_8, %c0_9] : memref<4x384xbf16, #tpu.memory_space<vmem>>, vector<4x256xbf16>
    %c0_10 = arith.constant 0 : index
    %c0_11 = arith.constant 0 : index
    %c0_12 = arith.constant 0 : index
    %9 = vector.load %arg2[%c0_10, %c0_11, %c0_12] : memref<9x10x4xbf16, #tpu.memory_space<vmem>>, vector<1x10x4xbf16>
    %10 = vector.shape_cast %9 : vector<1x10x4xbf16> to vector<10x4xbf16>
    %cst_13 = arith.constant dense<0.000000e+00> : vector<10x256xf32>
    %11 = tpu.matmul %10, %8, %cst_13 {dimension_numbers = #tpu.dot_dimension_numbers<[1], [0], [0], [1], [0, 0, 1, 1], [], []>} : vector<10x4xbf16>, vector<4x256xbf16>, vector<10x256xf32> -> vector<10x256xf32>
    %12 = arith.addf %7, %11 : vector<10x256xf32>
    %c0_14 = arith.constant 0 : index
    %c1 = arith.constant 1 : index
    %13 = vector.load %arg5[%c0_14, %c1] : memref<4x384xbf16, #tpu.memory_space<vmem>>, vector<4x256xbf16>
    %c1_15 = arith.constant 1 : index
    %c0_16 = arith.constant 0 : index
    %c0_17 = arith.constant 0 : index
    %14 = vector.load %arg2[%c1_15, %c0_16, %c0_17] : memref<9x10x4xbf16, #tpu.memory_space<vmem>>, vector<1x10x4xbf16>
    %15 = vector.shape_cast %14 : vector<1x10x4xbf16> to vector<10x4xbf16>
    %cst_18 = arith.constant dense<0.000000e+00> : vector<10x256xf32>
    %16 = tpu.matmul %15, %13, %cst_18 {dimension_numbers = #tpu.dot_dimension_numbers<[1], [0], [0], [1], [0, 0, 1, 1], [], []>} : vector<10x4xbf16>, vector<4x256xbf16>, vector<10x256xf32> -> vector<10x256xf32>
    %17 = arith.addf %12, %16 : vector<10x256xf32>
    %c0_19 = arith.constant 0 : index
    %c2 = arith.constant 2 : index
    %18 = vector.load %arg5[%c0_19, %c2] : memref<4x384xbf16, #tpu.memory_space<vmem>>, vector<4x256xbf16>
    %c2_20 = arith.constant 2 : index
    %c0_21 = arith.constant 0 : index
    %c0_22 = arith.constant 0 : index
    %19 = vector.load %arg2[%c2_20, %c0_21, %c0_22] : memref<9x10x4xbf16, #tpu.memory_space<vmem>>, vector<1x10x4xbf16>
    %20 = vector.shape_cast %19 : vector<1x10x4xbf16> to vector<10x4xbf16>
    %cst_23 = arith.constant dense<0.000000e+00> : vector<10x256xf32>
    %21 = tpu.matmul %20, %18, %cst_23 {dimension_numbers = #tpu.dot_dimension_numbers<[1], [0], [0], [1], [0, 0, 1, 1], [], []>} : vector<10x4xbf16>, vector<4x256xbf16>, vector<10x256xf32> -> vector<10x256xf32>
    %22 = arith.addf %17, %21 : vector<10x256xf32>
    %c0_24 = arith.constant 0 : index
    %c16 = arith.constant 16 : index
    %23 = vector.load %arg5[%c0_24, %c16] : memref<4x384xbf16, #tpu.memory_space<vmem>>, vector<4x256xbf16>
    %c3 = arith.constant 3 : index
    %c0_25 = arith.constant 0 : index
    %c0_26 = arith.constant 0 : index
    %24 = vector.load %arg2[%c3, %c0_25, %c0_26] : memref<9x10x4xbf16, #tpu.memory_space<vmem>>, vector<1x10x4xbf16>
    %25 = vector.shape_cast %24 : vector<1x10x4xbf16> to vector<10x4xbf16>
    %cst_27 = arith.constant dense<0.000000e+00> : vector<10x256xf32>
    %26 = tpu.matmul %25, %23, %cst_27 {dimension_numbers = #tpu.dot_dimension_numbers<[1], [0], [0], [1], [0, 0, 1, 1], [], []>} : vector<10x4xbf16>, vector<4x256xbf16>, vector<10x256xf32> -> vector<10x256xf32>
    %27 = arith.addf %22, %26 : vector<10x256xf32>
    %c0_28 = arith.constant 0 : index
    %c17 = arith.constant 17 : index
    %28 = vector.load %arg5[%c0_28, %c17] : memref<4x384xbf16, #tpu.memory_space<vmem>>, vector<4x256xbf16>
    %c4 = arith.constant 4 : index
    %c0_29 = arith.constant 0 : index
    %c0_30 = arith.constant 0 : index
    %29 = vector.load %arg2[%c4, %c0_29, %c0_30] : memref<9x10x4xbf16, #tpu.memory_space<vmem>>, vector<1x10x4xbf16>
    %30 = vector.shape_cast %29 : vector<1x10x4xbf16> to vector<10x4xbf16>
    %cst_31 = arith.constant dense<0.000000e+00> : vector<10x256xf32>
    %31 = tpu.matmul %30, %28, %cst_31 {dimension_numbers = #tpu.dot_dimension_numbers<[1], [0], [0], [1], [0, 0, 1, 1], [], []>} : vector<10x4xbf16>, vector<4x256xbf16>, vector<10x256xf32> -> vector<10x256xf32>
    %32 = arith.addf %27, %31 : vector<10x256xf32>
    %c0_32 = arith.constant 0 : index
    %c18 = arith.constant 18 : index
    %33 = vector.load %arg5[%c0_32, %c18] : memref<4x384xbf16, #tpu.memory_space<vmem>>, vector<4x256xbf16>
    %c5 = arith.constant 5 : index
    %c0_33 = arith.constant 0 : index
    %c0_34 = arith.constant 0 : index
    %34 = vector.load %arg2[%c5, %c0_33, %c0_34] : memref<9x10x4xbf16, #tpu.memory_space<vmem>>, vector<1x10x4xbf16>
    %35 = vector.shape_cast %34 : vector<1x10x4xbf16> to vector<10x4xbf16>
    %cst_35 = arith.constant dense<0.000000e+00> : vector<10x256xf32>
    %36 = tpu.matmul %35, %33, %cst_35 {dimension_numbers = #tpu.dot_dimension_numbers<[1], [0], [0], [1], [0, 0, 1, 1], [], []>} : vector<10x4xbf16>, vector<4x256xbf16>, vector<10x256xf32> -> vector<10x256xf32>
    %37 = arith.addf %32, %36 : vector<10x256xf32>
    %c0_36 = arith.constant 0 : index
    %c32 = arith.constant 32 : index
    %38 = vector.load %arg5[%c0_36, %c32] : memref<4x384xbf16, #tpu.memory_space<vmem>>, vector<4x256xbf16>
    %c6 = arith.constant 6 : index
    %c0_37 = arith.constant 0 : index
    %c0_38 = arith.constant 0 : index
    %39 = vector.load %arg2[%c6, %c0_37, %c0_38] : memref<9x10x4xbf16, #tpu.memory_space<vmem>>, vector<1x10x4xbf16>
    %40 = vector.shape_cast %39 : vector<1x10x4xbf16> to vector<10x4xbf16>
    %cst_39 = arith.constant dense<0.000000e+00> : vector<10x256xf32>
    %41 = tpu.matmul %40, %38, %cst_39 {dimension_numbers = #tpu.dot_dimension_numbers<[1], [0], [0], [1], [0, 0, 1, 1], [], []>} : vector<10x4xbf16>, vector<4x256xbf16>, vector<10x256xf32> -> vector<10x256xf32>
    %42 = arith.addf %37, %41 : vector<10x256xf32>
    %c0_40 = arith.constant 0 : index
    %c33 = arith.constant 33 : index
    %43 = vector.load %arg5[%c0_40, %c33] : memref<4x384xbf16, #tpu.memory_space<vmem>>, vector<4x256xbf16>
    %c7 = arith.constant 7 : index
    %c0_41 = arith.constant 0 : index
    %c0_42 = arith.constant 0 : index
    %44 = vector.load %arg2[%c7, %c0_41, %c0_42] : memref<9x10x4xbf16, #tpu.memory_space<vmem>>, vector<1x10x4xbf16>
    %45 = vector.shape_cast %44 : vector<1x10x4xbf16> to vector<10x4xbf16>
    %cst_43 = arith.constant dense<0.000000e+00> : vector<10x256xf32>
    %46 = tpu.matmul %45, %43, %cst_43 {dimension_numbers = #tpu.dot_dimension_numbers<[1], [0], [0], [1], [0, 0, 1, 1], [], []>} : vector<10x4xbf16>, vector<4x256xbf16>, vector<10x256xf32> -> vector<10x256xf32>
    %47 = arith.addf %42, %46 : vector<10x256xf32>
    %c0_44 = arith.constant 0 : index
    %c34 = arith.constant 34 : index
    %48 = vector.load %arg5[%c0_44, %c34] : memref<4x384xbf16, #tpu.memory_space<vmem>>, vector<4x256xbf16>
    %c8 = arith.constant 8 : index
    %c0_45 = arith.constant 0 : index
    %c0_46 = arith.constant 0 : index
    %49 = vector.load %arg2[%c8, %c0_45, %c0_46] : memref<9x10x4xbf16, #tpu.memory_space<vmem>>, vector<1x10x4xbf16>
    %50 = vector.shape_cast %49 : vector<1x10x4xbf16> to vector<10x4xbf16>
    %cst_47 = arith.constant dense<0.000000e+00> : vector<10x256xf32>
    %51 = tpu.matmul %50, %48, %cst_47 {dimension_numbers = #tpu.dot_dimension_numbers<[1], [0], [0], [1], [0, 0, 1, 1], [], []>} : vector<10x4xbf16>, vector<4x256xbf16>, vector<10x256xf32> -> vector<10x256xf32>
    %52 = arith.addf %47, %51 : vector<10x256xf32>
    %53 = vector.broadcast %0 : vector<10x1xf32> to vector<10x256xf32>
    %54 = arith.addf %52, %53 : vector<10x256xf32>
    %c0_48 = arith.constant 0 : index
    %c0_49 = arith.constant 0 : index
    %c0_50 = arith.constant 0 : index
    %55 = vector.load %arg4[%c0_48, %c0_49, %c0_50] : memref<2x10x256xf32, #tpu.memory_space<vmem>>, vector<1x10x256xf32>
    %56 = vector.shape_cast %55 : vector<1x10x256xf32> to vector<10x256xf32>
    %57 = vector.shape_cast %54 : vector<10x256xf32> to vector<1x10x256xf32>
    tpu.vector_store %arg4[%c0_48, %c0_49, %c0_50], %57 {strides = array<i32>} : memref<2x10x256xf32, #tpu.memory_space<vmem>>, vector<1x10x256xf32>,
    %c1_51 = arith.constant 1 : index
    %c0_52 = arith.constant 0 : index
    %c0_53 = arith.constant 0 : index
    %58 = vector.load %arg1[%c1_51, %c0_52, %c0_53] : memref<2x4x256xf32, #tpu.memory_space<vmem>>, vector<1x4x256xf32>
    %59 = vector.shape_cast %58 : vector<1x4x256xf32> to vector<4x256xf32>
    %60 = arith.truncf %59 : vector<4x256xf32> to vector<4x256xbf16>
    %c0_54 = arith.constant 0 : index
    %c0_55 = arith.constant 0 : index
    %61 = vector.load %arg5[%c0_54, %c0_55] : memref<4x384xbf16, #tpu.memory_space<vmem>>, vector<4x256xbf16>
    tpu.vector_store %arg5[%c0_54, %c0_55], %60 {strides = array<i32>} : memref<4x384xbf16, #tpu.memory_space<vmem>>, vector<4x256xbf16>,
    %cst_56 = arith.constant 0.000000e+00 : f32
    %62 = vector.broadcast %cst_56 : f32 to vector<10x256xf32>
    %c0_57 = arith.constant 0 : index
    %c0_58 = arith.constant 0 : index
    %63 = vector.load %arg5[%c0_57, %c0_58] : memref<4x384xbf16, #tpu.memory_space<vmem>>, vector<4x256xbf16>
    %c0_59 = arith.constant 0 : index
    %c0_60 = arith.constant 0 : index
    %c0_61 = arith.constant 0 : index
    %64 = vector.load %arg2[%c0_59, %c0_60, %c0_61] : memref<9x10x4xbf16, #tpu.memory_space<vmem>>, vector<1x10x4xbf16>
    %65 = vector.shape_cast %64 : vector<1x10x4xbf16> to vector<10x4xbf16>
    %cst_62 = arith.constant dense<0.000000e+00> : vector<10x256xf32>
    %66 = tpu.matmul %65, %63, %cst_62 {dimension_numbers = #tpu.dot_dimension_numbers<[1], [0], [0], [1], [0, 0, 1, 1], [], []>} : vector<10x4xbf16>, vector<4x256xbf16>, vector<10x256xf32> -> vector<10x256xf32>
    %67 = arith.addf %62, %66 : vector<10x256xf32>
    %c0_63 = arith.constant 0 : index
    %c1_64 = arith.constant 1 : index
    %68 = vector.load %arg5[%c0_63, %c1_64] : memref<4x384xbf16, #tpu.memory_space<vmem>>, vector<4x256xbf16>
    %c1_65 = arith.constant 1 : index
    %c0_66 = arith.constant 0 : index
    %c0_67 = arith.constant 0 : index
    %69 = vector.load %arg2[%c1_65, %c0_66, %c0_67] : memref<9x10x4xbf16, #tpu.memory_space<vmem>>, vector<1x10x4xbf16>
    %70 = vector.shape_cast %69 : vector<1x10x4xbf16> to vector<10x4xbf16>
    %cst_68 = arith.constant dense<0.000000e+00> : vector<10x256xf32>
    %71 = tpu.matmul %70, %68, %cst_68 {dimension_numbers = #tpu.dot_dimension_numbers<[1], [0], [0], [1], [0, 0, 1, 1], [], []>} : vector<10x4xbf16>, vector<4x256xbf16>, vector<10x256xf32> -> vector<10x256xf32>
    %72 = arith.addf %67, %71 : vector<10x256xf32>
    %c0_69 = arith.constant 0 : index
    %c2_70 = arith.constant 2 : index
    %73 = vector.load %arg5[%c0_69, %c2_70] : memref<4x384xbf16, #tpu.memory_space<vmem>>, vector<4x256xbf16>
    %c2_71 = arith.constant 2 : index
    %c0_72 = arith.constant 0 : index
    %c0_73 = arith.constant 0 : index
    %74 = vector.load %arg2[%c2_71, %c0_72, %c0_73] : memref<9x10x4xbf16, #tpu.memory_space<vmem>>, vector<1x10x4xbf16>
    %75 = vector.shape_cast %74 : vector<1x10x4xbf16> to vector<10x4xbf16>
    %cst_74 = arith.constant dense<0.000000e+00> : vector<10x256xf32>
    %76 = tpu.matmul %75, %73, %cst_74 {dimension_numbers = #tpu.dot_dimension_numbers<[1], [0], [0], [1], [0, 0, 1, 1], [], []>} : vector<10x4xbf16>, vector<4x256xbf16>, vector<10x256xf32> -> vector<10x256xf32>
    %77 = arith.addf %72, %76 : vector<10x256xf32>
    %c0_75 = arith.constant 0 : index
    %c16_76 = arith.constant 16 : index
    %78 = vector.load %arg5[%c0_75, %c16_76] : memref<4x384xbf16, #tpu.memory_space<vmem>>, vector<4x256xbf16>
    %c3_77 = arith.constant 3 : index
    %c0_78 = arith.constant 0 : index
    %c0_79 = arith.constant 0 : index
    %79 = vector.load %arg2[%c3_77, %c0_78, %c0_79] : memref<9x10x4xbf16, #tpu.memory_space<vmem>>, vector<1x10x4xbf16>
    %80 = vector.shape_cast %79 : vector<1x10x4xbf16> to vector<10x4xbf16>
    %cst_80 = arith.constant dense<0.000000e+00> : vector<10x256xf32>
    %81 = tpu.matmul %80, %78, %cst_80 {dimension_numbers = #tpu.dot_dimension_numbers<[1], [0], [0], [1], [0, 0, 1, 1], [], []>} : vector<10x4xbf16>, vector<4x256xbf16>, vector<10x256xf32> -> vector<10x256xf32>
    %82 = arith.addf %77, %81 : vector<10x256xf32>
    %c0_81 = arith.constant 0 : index
    %c17_82 = arith.constant 17 : index
    %83 = vector.load %arg5[%c0_81, %c17_82] : memref<4x384xbf16, #tpu.memory_space<vmem>>, vector<4x256xbf16>
    %c4_83 = arith.constant 4 : index
    %c0_84 = arith.constant 0 : index
    %c0_85 = arith.constant 0 : index
    %84 = vector.load %arg2[%c4_83, %c0_84, %c0_85] : memref<9x10x4xbf16, #tpu.memory_space<vmem>>, vector<1x10x4xbf16>
    %85 = vector.shape_cast %84 : vector<1x10x4xbf16> to vector<10x4xbf16>
    %cst_86 = arith.constant dense<0.000000e+00> : vector<10x256xf32>
    %86 = tpu.matmul %85, %83, %cst_86 {dimension_numbers = #tpu.dot_dimension_numbers<[1], [0], [0], [1], [0, 0, 1, 1], [], []>} : vector<10x4xbf16>, vector<4x256xbf16>, vector<10x256xf32> -> vector<10x256xf32>
    %87 = arith.addf %82, %86 : vector<10x256xf32>
    %c0_87 = arith.constant 0 : index
    %c18_88 = arith.constant 18 : index
    %88 = vector.load %arg5[%c0_87, %c18_88] : memref<4x384xbf16, #tpu.memory_space<vmem>>, vector<4x256xbf16>
    %c5_89 = arith.constant 5 : index
    %c0_90 = arith.constant 0 : index
    %c0_91 = arith.constant 0 : index
    %89 = vector.load %arg2[%c5_89, %c0_90, %c0_91] : memref<9x10x4xbf16, #tpu.memory_space<vmem>>, vector<1x10x4xbf16>
    %90 = vector.shape_cast %89 : vector<1x10x4xbf16> to vector<10x4xbf16>
    %cst_92 = arith.constant dense<0.000000e+00> : vector<10x256xf32>
    %91 = tpu.matmul %90, %88, %cst_92 {dimension_numbers = #tpu.dot_dimension_numbers<[1], [0], [0], [1], [0, 0, 1, 1], [], []>} : vector<10x4xbf16>, vector<4x256xbf16>, vector<10x256xf32> -> vector<10x256xf32>
    %92 = arith.addf %87, %91 : vector<10x256xf32>
    %c0_93 = arith.constant 0 : index
    %c32_94 = arith.constant 32 : index
    %93 = vector.load %arg5[%c0_93, %c32_94] : memref<4x384xbf16, #tpu.memory_space<vmem>>, vector<4x256xbf16>
    %c6_95 = arith.constant 6 : index
    %c0_96 = arith.constant 0 : index
    %c0_97 = arith.constant 0 : index
    %94 = vector.load %arg2[%c6_95, %c0_96, %c0_97] : memref<9x10x4xbf16, #tpu.memory_space<vmem>>, vector<1x10x4xbf16>
    %95 = vector.shape_cast %94 : vector<1x10x4xbf16> to vector<10x4xbf16>
    %cst_98 = arith.constant dense<0.000000e+00> : vector<10x256xf32>
    %96 = tpu.matmul %95, %93, %cst_98 {dimension_numbers = #tpu.dot_dimension_numbers<[1], [0], [0], [1], [0, 0, 1, 1], [], []>} : vector<10x4xbf16>, vector<4x256xbf16>, vector<10x256xf32> -> vector<10x256xf32>
    %97 = arith.addf %92, %96 : vector<10x256xf32>
    %c0_99 = arith.constant 0 : index
    %c33_100 = arith.constant 33 : index
    %98 = vector.load %arg5[%c0_99, %c33_100] : memref<4x384xbf16, #tpu.memory_space<vmem>>, vector<4x256xbf16>
    %c7_101 = arith.constant 7 : index
    %c0_102 = arith.constant 0 : index
    %c0_103 = arith.constant 0 : index
    %99 = vector.load %arg2[%c7_101, %c0_102, %c0_103] : memref<9x10x4xbf16, #tpu.memory_space<vmem>>, vector<1x10x4xbf16>
    %100 = vector.shape_cast %99 : vector<1x10x4xbf16> to vector<10x4xbf16>
    %cst_104 = arith.constant dense<0.000000e+00> : vector<10x256xf32>
    %101 = tpu.matmul %100, %98, %cst_104 {dimension_numbers = #tpu.dot_dimension_numbers<[1], [0], [0], [1], [0, 0, 1, 1], [], []>} : vector<10x4xbf16>, vector<4x256xbf16>, vector<10x256xf32> -> vector<10x256xf32>
    %102 = arith.addf %97, %101 : vector<10x256xf32>
    %c0_105 = arith.constant 0 : index
    %c34_106 = arith.constant 34 : index
    %103 = vector.load %arg5[%c0_105, %c34_106] : memref<4x384xbf16, #tpu.memory_space<vmem>>, vector<4x256xbf16>
    %c8_107 = arith.constant 8 : index
    %c0_108 = arith.constant 0 : index
    %c0_109 = arith.constant 0 : index
    %104 = vector.load %arg2[%c8_107, %c0_108, %c0_109] : memref<9x10x4xbf16, #tpu.memory_space<vmem>>, vector<1x10x4xbf16>
    %105 = vector.shape_cast %104 : vector<1x10x4xbf16> to vector<10x4xbf16>
    %cst_110 = arith.constant dense<0.000000e+00> : vector<10x256xf32>
    %106 = tpu.matmul %105, %103, %cst_110 {dimension_numbers = #tpu.dot_dimension_numbers<[1], [0], [0], [1], [0, 0, 1, 1], [], []>} : vector<10x4xbf16>, vector<4x256xbf16>, vector<10x256xf32> -> vector<10x256xf32>
    %107 = arith.addf %102, %106 : vector<10x256xf32>
    %108 = vector.broadcast %0 : vector<10x1xf32> to vector<10x256xf32>
    %109 = arith.addf %107, %108 : vector<10x256xf32>
    %c1_111 = arith.constant 1 : index
    %c0_112 = arith.constant 0 : index
    %c0_113 = arith.constant 0 : index
    %110 = vector.load %arg4[%c1_111, %c0_112, %c0_113] : memref<2x10x256xf32, #tpu.memory_space<vmem>>, vector<1x10x256xf32>
    %111 = vector.shape_cast %110 : vector<1x10x256xf32> to vector<10x256xf32>
    %112 = vector.shape_cast %109 : vector<10x256xf32> to vector<1x10x256xf32>
    tpu.vector_store %arg4[%c1_111, %c0_112, %c0_113], %112 {strides = array<i32>} : memref<2x10x256xf32, #tpu.memory_space<vmem>>, vector<1x10x256xf32>,
    return
  }
  func.func @transform_0(%arg0: i32) -> (i32, i32, i32) {
    %c0_i32 = arith.constant 0 : i32
    %c0_i32_0 = arith.constant 0 : i32
    %c0_i32_1 = arith.constant 0 : i32
    return %arg0, %c0_i32, %c0_i32_0 : i32, i32, i32
  }
  func.func @transform_1(%arg0: i32) -> (i32, i32, i32) {
    %c0_i32 = arith.constant 0 : i32
    %c0_i32_0 = arith.constant 0 : i32
    %c0_i32_1 = arith.constant 0 : i32
    %c0_i32_2 = arith.constant 0 : i32
    return %c0_i32, %c0_i32_0, %c0_i32_1 : i32, i32, i32
  }
  func.func @transform_2(%arg0: i32) -> (i32, i32) {
    %c0_i32 = arith.constant 0 : i32
    %c0_i32_0 = arith.constant 0 : i32
    %c0_i32_1 = arith.constant 0 : i32
    return %c0_i32, %c0_i32_0 : i32, i32
  }
  func.func @transform_3(%arg0: i32) -> (i32, i32, i32) {
    %c0_i32 = arith.constant 0 : i32
    %c0_i32_0 = arith.constant 0 : i32
    %c0_i32_1 = arith.constant 0 : i32
    return %arg0, %c0_i32, %c0_i32_0 : i32, i32, i32
  }
}

</mosaic_0001>

<bundles_post_ra>
// kernel: _lambda_.1
= control target key start
LH: loop header
LB: loop body
LE: loop exit
PB: predicated region body
PF: predicated region fallthrough
CT: control target
= control target key end

     0   :  { %v1859_v0 = vmov 0   ;;  %v1860_v3 = vmov 1983009808   ;;  %v53_v5 = vlaneseq  ;;  %s1861_s16 = smov 127   ;;  %s1863_s17 = smov 112   ;;  %vm71_vm0 = vcmask 1039360   ;;  %s2159_s0 = inlined_call_operand.vmem [shape: f32[2,4,256], index: 0, kind: input, shape index: {}]   ;;  %s2160_s1 = inlined_call_operand.vmem [shape: bf16[9,10,4], index: 1, kind: input, shape index: {}]   ;;  %s2161_s2 = inlined_call_operand.vmem [shape: f32[10,1], index: 2, kind: input, shape index: {}]   ;;  %s2162_s3 = inlined_call_operand.vmem [shape: f32[2,10,256], index: 3, kind: output, shape index: {}]  }
   0x1   :  { %17 = vst [vmem:[#allocation2 + $0x4] sm:$0x3] %v1859_v0  ;;  %v18_v1 = vld [vmem:[%s2159_s0] sm:$0xff]  ;;  %117 = vmatprep.mubr.bf16.mxu0 %v1859_v0  ;;  %945 = vmatprep.mubr.bf16.mxu1 %v1859_v0  ;;  %v51_v4 = vunpack.c.l.s4 %v1860_v3  ;;  %v1704_v9 = vld [vmem:[%s2159_s0 + $0x8] sm:$0xff]  ;;  %s1862_s0 = smov 126   ;;  %s1864_s18 = smov 111  }
   0x2   :  { %v20_v2 = vcombine.high %v18_v1, %v18_v1  ;;  %1829 = vset.pattern.permute.xlu0 %v1859_v0  ;;  %1830 = vset.pattern.permute.xlu1 %v1859_v0  ;;  %v54_v8 = vshrl.u32 %v53_v5, 7  ;;  %v852_v10 = vcombine.high %v1704_v9, %v1704_v9  ;;  %s1865_s19 = smov 110   ;;  %s1866_s20 = smov 96   ;;  %vm78_vm1 = vcmask 1041408  }
   0x3   :  { %v52_v7 = vunpack.c.0.s8 %v51_v4  ;;  %s1867_s21 = smov 95   ;;  %s1868_s22 = smov 94   ;;  %vm74_vm2 = vcmask 31744   ;;  %vm226_vm3 = vcmask 1031168   ;;  %vm317_vm4 = vcmask 916480  }
   0x4   :  { %v1658_v6 = vpack.c.bf16 %v20_v2, %v18_v1  ;;  %v1705_v15 = vpack.c.bf16 %v852_v10, %v1704_v9  ;;  %vm408_vm5 = vcmask 908288   ;;  %vm499_vm6 = vcmask 900096  }
   0x5   :  { %v1900_v11 = vsub.s32 %v52_v7, %v54_v8  ;;  %vm590_vm7 = vcmask 785408   ;;  %vm681_vm8 = vcmask 777216   ;;  %vm772_vm9 = vcmask 769024  }
   0x6   :  { %1659 = vst.sshfl [vmem:[#allocation2] sm:$0x33 pattern:$0x76325410] %v1658_v6 }
   0xd   :  { %v39_v12 = vld [vmem:[#allocation2] sm:$0x3f] }
   0xe   :  { %v194_v13 = vld [vmem:[#allocation2] sm:$0x3f]  ;;  %v56_v16 = vrot.slane %v39_v12, %v1900_v11  ;;  %v49_v20 = vcombine.high %v39_v12, %v39_v12 }
   0xf   :  { %v285_v14 = vld [vmem:[#allocation2] sm:$0x3f]  ;;  %v211_v39 = vrot.slane %v194_v13, %v1900_v11  ;;  %v204_v40 = vcombine.high %v194_v13, %v194_v13 }
  0x10   :  { %v1903_v17 = vld [vmem:[#allocation2] sm:$0x3f]  ;;  %65 = vrot.lane.b32.xlu0 %v56_v16, %s1861_s16  ;;  %v64_v24 = vcombine.high %v56_v16, %v56_v16  ;;  %v63_v25 = vrot.slane %v49_v20, %v1900_v11  ;;  %v302_v48 = vrot.slane %v285_v14, %v1900_v11  ;;  %v295_v49 = vcombine.high %v285_v14, %v285_v14 }
  0x11   :  { %v1905_v18 = vld [vmem:[#allocation2] sm:$0x3f]  ;;  %v219_v41 = vcombine.high %v211_v39, %v211_v39  ;;  %v218_v43 = vrot.slane %v204_v40, %v1900_v11  ;;  %v393_v57 = vrot.slane %v1903_v17, %v1900_v11  ;;  %v386_v58 = vcombine.high %v1903_v17, %v1903_v17 }
  0x12   :  { %v1907_v19 = vld [vmem:[#allocation2] sm:$0x3f]  ;;  %69 = vrot.lane.b32.xlu1 %v63_v25, %s1861_s16  ;;  %v310_v50 = vcombine.high %v302_v48, %v302_v48  ;;  %v309_v52 = vrot.slane %v295_v49, %v1900_v11  ;;  %v484_v3 = vrot.slane %v1905_v18, %v1900_v11  ;;  %v477_v4 = vcombine.high %v1905_v18, %v1905_v18 }
  0x13   :  { %v649_v21 = vld [vmem:[#allocation2] sm:$0x3f]  ;;  %v568_v26 = vcombine.high %v1907_v19, %v1907_v19  ;;  %v401_v59 = vcombine.high %v393_v57, %v393_v57  ;;  %v400_v61 = vrot.slane %v386_v58, %v1900_v11  ;;  %v575_v13 = vrot.slane %v1907_v19, %v1900_v11 }
  0x14   :  { %v740_v22 = vld [vmem:[#allocation2] sm:$0x3f]  ;;  %v1915_v27 = vrot.slane %v649_v21, %v1900_v11  ;;  %v659_v28 = vcombine.high %v649_v21, %v649_v21  ;;  %67 = vrot.lane.b32.xlu0 %v64_v24, %s1861_s16  ;;  %v492_v5 = vcombine.high %v484_v3, %v484_v3  ;;  %v491_v7 = vrot.slane %v477_v4, %v1900_v11 }
  0x15   :  { %v1909_v23 = vld.sshfl [vmem:[#allocation2] sm:$0x33 pattern:$0x76325410]  ;;  %v1918_v29 = vrot.slane %v740_v22, %v1900_v11  ;;  %v750_v30 = vcombine.high %v740_v22, %v740_v22  ;;  %v1921_v31 = vrot.slane %v568_v26, %v1900_v11  ;;  %v583_v14 = vcombine.high %v575_v13, %v575_v13 }
  0x16   :  { %1706 = vst.sshfl [vmem:[#allocation2] sm:$0x33 pattern:$0x76325410] %v1705_v15  ;;  %v1924_v32 = vrot.slane %v659_v28, %v1900_v11  ;;  %v674_v19 = vcombine.high %v1915_v27, %v1915_v27 }
  0x17   :  { %v1927_v33 = vrot.slane %v750_v30, %v1900_v11  ;;  %v765_v28 = vcombine.high %v1918_v29, %v1918_v29 }
  0x1d   :  { %v871_v34 = vld [vmem:[#allocation2] sm:$0x3f] }
  0x1e   :  { %v887_v35 = vrot.slane %v871_v34, %v1900_v11  ;;  %v880_v36 = vcombine.high %v871_v34, %v871_v34  ;;  %v1022_v42 = vld [vmem:[#allocation2] sm:$0x3f] }
  0x1f   :  { %v1038_v44 = vrot.slane %v1022_v42, %v1900_v11  ;;  %v1031_v45 = vcombine.high %v1022_v42, %v1022_v42  ;;  %v1111_v51 = vld [vmem:[#allocation2] sm:$0x3f]  ;;  %v146_v42 = vsel %vm78_vm1, %v1909_v23, 0 }
  0x20   :  { %896 = vrot.lane.b32.xlu1 %v887_v35, %s1861_s16  ;;  %v895_v37 = vcombine.high %v887_v35, %v887_v35  ;;  %v894_v38 = vrot.slane %v880_v36, %v1900_v11  ;;  %v1127_v53 = vrot.slane %v1111_v51, %v1900_v11  ;;  %v1120_v54 = vcombine.high %v1111_v51, %v1111_v51  ;;  %v1200_v60 = vld [vmem:[#allocation2] sm:$0x3f] }
  0x21   :  { %v1046_v46 = vcombine.high %v1038_v44, %v1038_v44  ;;  %v1045_v47 = vrot.slane %v1031_v45, %v1900_v11  ;;  %v1216_v62 = vrot.slane %v1200_v60, %v1900_v11  ;;  %v1209_v63 = vcombine.high %v1200_v60, %v1200_v60  ;;  %v1289_v6 = vld [vmem:[#allocation2] sm:$0x3f] }
  0x22   :  { %898 = vrot.lane.b32.xlu0 %v895_v37, %s1861_s16  ;;  %v1135_v55 = vcombine.high %v1127_v53, %v1127_v53  ;;  %v1134_v56 = vrot.slane %v1120_v54, %v1900_v11  ;;  %v1305_v8 = vrot.slane %v1289_v6, %v1900_v11  ;;  %v1298_v9 = vcombine.high %v1289_v6, %v1289_v6  ;;  %v1378_v15 = vld [vmem:[#allocation2] sm:$0x3f] }
  0x23   :  { %v1224_v1 = vcombine.high %v1216_v62, %v1216_v62  ;;  %v1223_v2 = vrot.slane %v1209_v63, %v1900_v11  ;;  %v1394_v16 = vrot.slane %v1378_v15, %v1900_v11  ;;  %v1387_v17 = vcombine.high %v1378_v15, %v1378_v15  ;;  %v1467_v21 = vld [vmem:[#allocation2] sm:$0x3f] }
  0x24   :  { %900 = vrot.lane.b32.xlu1 %v894_v38, %s1861_s16  ;;  %v1313_v10 = vcombine.high %v1305_v8, %v1305_v8  ;;  %v1312_v12 = vrot.slane %v1298_v9, %v1900_v11  ;;  %v1483_v22 = vrot.slane %v1467_v21, %v1900_v11  ;;  %v1476_v24 = vcombine.high %v1467_v21, %v1467_v21  ;;  %v1556_v30 = vld [vmem:[#allocation2] sm:$0x3f] }
  0x25   :  { %v1402_v18 = vcombine.high %v1394_v16, %v1394_v16  ;;  %v1401_v20 = vrot.slane %v1387_v17, %v1900_v11  ;;  %v15_v35 = vld [vmem:[%s2161_s2] sm:$0xff]  ;;  %v1846_v17 = vld [vmem:[%s2160_s1 + $0x10] sm:$0x1f]  }
  0x26   :  { %220 = vrot.lane.b32.xlu0 %v211_v39, %s1862_s0  ;;  %v1491_v25 = vcombine.high %v1483_v22, %v1483_v22  ;;  %v1490_v26 = vrot.slane %v1476_v24, %v1900_v11 }
  0x28   :  { %222 = vrot.lane.b32.xlu1 %v219_v41, %s1862_s0  ;;  %v1841_v41 = vld [vmem:[%s2160_s1 + $0x8] sm:$0x1f]  }
  0x2a   :  { %224 = vrot.lane.b32.xlu0 %v218_v43, %s1862_s0 }
  0x2c   :  { %1047 = vrot.lane.b32.xlu1 %v1038_v44, %s1862_s0  ;;  %v1713_v44 = vld.sshfl [vmem:[#allocation2] sm:$0x33 pattern:$0x76325410] }
  0x2d   :  { %v974_v54 = vsel %vm78_vm1, %v1713_v44, 0 }
  0x2e   :  { %1049 = vrot.lane.b32.xlu0 %v1046_v46, %s1862_s0 }
  0x30   :  { %1051 = vrot.lane.b32.xlu1 %v1045_v47, %s1862_s0 }
  0x32   :  { %311 = vrot.lane.b32.xlu0 %v302_v48, %s1863_s17  ;;  %v969_v48 = vcombine.high %v1713_v44, %v1713_v44 }
  0x34   :  { %313 = vrot.lane.b32.xlu1 %v310_v50, %s1863_s17 }
  0x36   :  { %315 = vrot.lane.b32.xlu0 %v309_v52, %s1863_s17  ;;  %v1843_v52 = vld [vmem:[%s2160_s1] sm:$0x1f]  }
  0x38   :  { %1136 = vrot.lane.b32.xlu1 %v1127_v53, %s1863_s17 }
  0x3a   :  { %1138 = vrot.lane.b32.xlu0 %v1135_v55, %s1863_s17 }
  0x3c   :  { %1140 = vrot.lane.b32.xlu1 %v1134_v56, %s1863_s17 }
  0x3e   :  { %402 = vrot.lane.b32.xlu0 %v393_v57, %s1864_s18 }
  0x40   :  { %404 = vrot.lane.b32.xlu1 %v401_v59, %s1864_s18 }
  0x42   :  { %406 = vrot.lane.b32.xlu0 %v400_v61, %s1864_s18 }
  0x44   :  { %1225 = vrot.lane.b32.xlu1 %v1216_v62, %s1864_s18 }
  0x46   :  { %1227 = vrot.lane.b32.xlu0 %v1224_v1, %s1864_s18 }
  0x48   :  { %1229 = vrot.lane.b32.xlu1 %v1223_v2, %s1864_s18  ;;  %v1844_v2 = vld [vmem:[%s2160_s1] sm:$0x1f]  }
  0x4a   :  { %493 = vrot.lane.b32.xlu0 %v484_v3, %s1865_s19  ;;  %v1845_v3 = vld [vmem:[%s2160_s1 + $0x10] sm:$0x1f]  }
  0x4c   :  { %495 = vrot.lane.b32.xlu1 %v492_v5, %s1865_s19 }
  0x4e   :  { %497 = vrot.lane.b32.xlu0 %v491_v7, %s1865_s19 }
  0x50   :  { %1314 = vrot.lane.b32.xlu1 %v1305_v8, %s1865_s19 }
  0x52   :  { %1316 = vrot.lane.b32.xlu0 %v1313_v10, %s1865_s19 }
  0x54   :  { %1318 = vrot.lane.b32.xlu1 %v1312_v12, %s1865_s19 }
  0x56   :  { %584 = vrot.lane.b32.xlu0 %v575_v13, %s1866_s20 }
  0x58   :  { %586 = vrot.lane.b32.xlu1 %v583_v14, %s1866_s20 }
  0x5a   :  { %588 = vrot.lane.b32.xlu0 %v1921_v31, %s1866_s20  ;;  %v1565_v31 = vcombine.high %v1556_v30, %v1556_v30 }
  0x5c   :  { %1403 = vrot.lane.b32.xlu1 %v1394_v16, %s1866_s20  ;;  %v1579_v34 = vrot.slane %v1565_v31, %v1900_v11 }
  0x5e   :  { %1405 = vrot.lane.b32.xlu0 %v1402_v18, %s1866_s20  ;;  %v1847_v18 = vld [vmem:[%s2160_s1 + $0x18] sm:$0x1f]  }
  0x60   :  { %1407 = vrot.lane.b32.xlu1 %v1401_v20, %s1866_s20 }
  0x62   :  { %675 = vrot.lane.b32.xlu0 %v1915_v27, %s1867_s21  ;;  %v1572_v27 = vrot.slane %v1556_v30, %v1900_v11  ;;  %v141_v11 = vcombine.high %v1909_v23, %v1909_v23  ;;  %v1842_v23 = vld [vmem:[%s2160_s1 + $0x8] sm:$0x1f]  }
  0x64   :  { %677 = vrot.lane.b32.xlu1 %v674_v19, %s1867_s21 }
  0x66   :  { %679 = vrot.lane.b32.xlu0 %v1924_v32, %s1867_s21  ;;  %v1580_v32 = vcombine.high %v1572_v27, %v1572_v27 }
  0x68   :  { %1492 = vrot.lane.b32.xlu1 %v1483_v22, %s1867_s21 }
  0x6a   :  { %1494 = vrot.lane.b32.xlu0 %v1491_v25, %s1867_s21 }
  0x6c   :  { %1496 = vrot.lane.b32.xlu1 %v1490_v26, %s1867_s21 }
  0x6e   :  { %766 = vrot.lane.b32.xlu0 %v1918_v29, %s1868_s22  ;;  %v16_v29 = vld [vmem:[%s2161_s2 + $0x8] sm:$0x3] }
  0x70   :  { %768 = vrot.lane.b32.xlu1 %v765_v28, %s1868_s22 }
  0x72   :  { %770 = vrot.lane.b32.xlu0 %v1927_v33, %s1868_s22 }
  0x74   :  { %1581 = vrot.lane.b32.xlu1 %v1572_v27, %s1868_s22 }
  0x76   :  { %1583 = vrot.lane.b32.xlu0 %v1580_v32, %s1868_s22 }
  0x78   :  { %1585 = vrot.lane.b32.xlu1 %v1579_v34, %s1868_s22  ;;  %v1848_v34 = vld [vmem:[%s2160_s1 + $0x18] sm:$0x1f]  }
  0x7a   :  { %833 = vperm.xlu0 %1829, %v15_v35   ;;  %v1849_v35 = vld [vmem:[%s2160_s1 + $0x20] sm:$0x1f]  }
  0x7c   :  { %838 = vperm.xlu1 %1830, %v16_v29  }
  0x82   :  { %v66_v36 = vpop.permute.xlu0 %65 }
  0x84   :  { %v70_v37 = vpop.permute.xlu1 %69 }
  0x86   :  { %v68_v33 = vpop.permute.xlu0 %67 }
  0x87   :  { %v73_v38 = vsel %vm71_vm0, %v68_v33, %v70_v37  ;;  %v72_v39 = vsel %vm71_vm0, %v66_v36, %v68_v33 }
  0x88   :  { %1663 = vmatprep.subr.msk.bf16.mxu0 %vm78_vm1, %v73_v38  ;;  %v80_v40 = vsel %vm78_vm1, %v72_v39, 0 }
  0x89   :  { %86 = vmatpush1.bf16.msra.mxu0 %v80_v40 }
  0x8a   :  { %1667 = vmatprep.subr.msk.bf16.mxu0 %vm78_vm1, %v141_v11 }
  0x8c   :  { %1664 = vmatmul.mubr.msk.bf16.vlgmr.msra.gmra.mrb[0].mxu0 %vm74_vm2, %v1841_v41 }
  0x8d   :  { %152 = vmatpush1.bf16.msra.mxu0 %v146_v42  ;;  %183 = vmatprep.mubr.bf16.mxu0 %v1859_v0 }
  0x92   :  { %v897_v43 = vpop.permute.xlu1 %896 }
  0x94   :  { %v899_v45 = vpop.permute.xlu0 %898 }
  0x95   :  { %v902_v46 = vsel %vm71_vm0, %v897_v43, %v899_v45 }
  0x96   :  { %v901_v47 = vpop.permute.xlu1 %900  ;;  %v908_v50 = vsel %vm78_vm1, %v902_v46, 0  ;;  %v1851_v46 = vld [vmem:[%s2160_s1 + $0x28] sm:$0x1f]  }
  0x97   :  { %v903_v49 = vsel %vm71_vm0, %v899_v45, %v901_v47  ;;  %v1850_v45 = vld [vmem:[%s2160_s1 + $0x20] sm:$0x1f]  }
  0x98   :  { %1710 = vmatprep.subr.msk.bf16.mxu1 %vm78_vm1, %v903_v49  ;;  %v221_v51 = vpop.permute.xlu0 %220  ;;  %1668 = vmatmul.mubr.msk.bf16.vlgmr.msra.gmra.mrb[0].mxu0 %vm74_vm2, %v1843_v52 }
  0x99   :  { %914 = vmatpush1.bf16.msra.mxu1 %v908_v50  ;;  %270 = vmatprep.mubr.bf16.mxu0 %v1859_v0 }
  0x9a   :  { %1714 = vmatprep.subr.msk.bf16.mxu1 %vm78_vm1, %v969_v48  ;;  %v223_v53 = vpop.permute.xlu1 %222 }
  0x9b   :  { %v227_v55 = vsel %vm226_vm3, %v221_v51, %v223_v53 }
  0x9c   :  { %1711 = vmatmul.mubr.msk.bf16.vlgmr.msra.gmra.mrb[0].mxu1 %vm74_vm2, %v1842_v23  ;;  %v233_v56 = vsel %vm78_vm1, %v227_v55, 0  ;;  %v225_v57 = vpop.permute.xlu0 %224 }
  0x9d   :  { %980 = vmatpush1.bf16.msra.mxu1 %v974_v54  ;;  %v228_v58 = vsel %vm226_vm3, %v223_v53, %v225_v57  ;;  %1011 = vmatprep.mubr.bf16.mxu1 %v1859_v0 }
  0x9e   :  { %1672 = vmatprep.subr.msk.bf16.mxu0 %vm78_vm1, %v228_v58  ;;  %v1048_v59 = vpop.permute.xlu1 %1047  ;;  %v1852_v58 = vld [vmem:[%s2160_s1 + $0x28] sm:$0x1f]  }
  0x9f   :  { %239 = vmatpush1.bf16.msra.mxu0 %v233_v56 }
  0xa0   :  { %v1050_v60 = vpop.permute.xlu0 %1049 }
  0xa1   :  { %v1053_v62 = vsel %vm226_vm3, %v1048_v59, %v1050_v60  ;;  %v1853_v59 = vld [vmem:[%s2160_s1 + $0x30] sm:$0x1f]  }
  0xa2   :  { %v1052_v61 = vpop.permute.xlu1 %1051  ;;  %v1059_v4 = vsel %vm78_vm1, %v1053_v62, 0 }
  0xa3   :  { %v1054_v63 = vsel %vm226_vm3, %v1050_v60, %v1052_v61 }
  0xa4   :  { %v312_v1 = vpop.permute.xlu0 %311  ;;  %1719 = vmatprep.subr.msk.bf16.mxu1 %vm78_vm1, %v1054_v63  ;;  %1673 = vmatmul.mubr.msk.bf16.vlgmr.msra.gmra.mrb[0].mxu0 %vm74_vm2, %v1845_v3 }
  0xa5   :  { %361 = vmatprep.mubr.bf16.mxu0 %v1859_v0 }
  0xa6   :  { %v314_v5 = vpop.permute.xlu1 %313 }
  0xa7   :  { %v318_v6 = vsel %vm317_vm4, %v312_v1, %v314_v5 }
  0xa8   :  { %1715 = vmatmul.mubr.msk.bf16.vlgmr.msra.gmra.mrb[0].mxu1 %vm74_vm2, %v1844_v2  ;;  %v324_v7 = vsel %vm78_vm1, %v318_v6, 0  ;;  %v316_v8 = vpop.permute.xlu0 %315 }
  0xa9   :  { %1065 = vmatpush1.bf16.msra.mxu1 %v1059_v4  ;;  %v319_v9 = vsel %vm317_vm4, %v314_v5, %v316_v8  ;;  %1096 = vmatprep.mubr.bf16.mxu1 %v1859_v0 }
  0xaa   :  { %1677 = vmatprep.subr.msk.bf16.mxu0 %vm78_vm1, %v319_v9  ;;  %v1137_v10 = vpop.permute.xlu1 %1136  ;;  %v1854_v9 = vld [vmem:[%s2160_s1 + $0x30] sm:$0x1f]  }
  0xab   :  { %330 = vmatpush1.bf16.msra.mxu0 %v324_v7 }
  0xac   :  { %v1139_v12 = vpop.permute.xlu0 %1138 }
  0xad   :  { %v1142_v14 = vsel %vm317_vm4, %v1137_v10, %v1139_v12  ;;  %v1855_v10 = vld [vmem:[%s2160_s1 + $0x38] sm:$0x1f]  }
  0xae   :  { %v1141_v13 = vpop.permute.xlu1 %1140  ;;  %v1148_v20 = vsel %vm78_vm1, %v1142_v14, 0 }
  0xaf   :  { %v1143_v15 = vsel %vm317_vm4, %v1139_v12, %v1141_v13 }
  0xb0   :  { %v403_v16 = vpop.permute.xlu0 %402  ;;  %1724 = vmatprep.subr.msk.bf16.mxu1 %vm78_vm1, %v1143_v15  ;;  %1678 = vmatmul.mubr.msk.bf16.vlgmr.msra.gmra.mrb[0].mxu0 %vm74_vm2, %v1847_v18 }
  0xb1   :  { %452 = vmatprep.mubr.bf16.mxu0 %v1859_v0 }
  0xb2   :  { %v405_v19 = vpop.permute.xlu1 %404 }
  0xb3   :  { %v409_v21 = vsel %vm408_vm5, %v403_v16, %v405_v19 }
  0xb4   :  { %1720 = vmatmul.mubr.msk.bf16.vlgmr.msra.gmra.mrb[0].mxu1 %vm74_vm2, %v1846_v17  ;;  %v415_v22 = vsel %vm78_vm1, %v409_v21, 0  ;;  %v407_v24 = vpop.permute.xlu0 %406 }
  0xb5   :  { %1154 = vmatpush1.bf16.msra.mxu1 %v1148_v20  ;;  %v410_v25 = vsel %vm408_vm5, %v405_v19, %v407_v24  ;;  %1185 = vmatprep.mubr.bf16.mxu1 %v1859_v0  ;;  %v1856_v24 = vld [vmem:[%s2160_s1 + $0x38] sm:$0x1f]  }
  0xb6   :  { %1682 = vmatprep.subr.msk.bf16.mxu0 %vm78_vm1, %v410_v25  ;;  %v1226_v26 = vpop.permute.xlu1 %1225  ;;  %v1857_v25 = vld [vmem:[%s2160_s1 + $0x40] sm:$0x1f]  }
  0xb7   :  { %421 = vmatpush1.bf16.msra.mxu0 %v415_v22 }
  0xb8   :  { %v1228_v28 = vpop.permute.xlu0 %1227 }
  0xb9   :  { %v1231_v27 = vsel %vm408_vm5, %v1226_v26, %v1228_v28 }
  0xba   :  { %v1230_v30 = vpop.permute.xlu1 %1229  ;;  %v1237_v29 = vsel %vm78_vm1, %v1231_v27, 0 }
  0xbb   :  { %v1232_v31 = vsel %vm408_vm5, %v1228_v28, %v1230_v30  ;;  %v1858_v28 = vld [vmem:[%s2160_s1 + $0x40] sm:$0x1f]  }
  0xbc   :  { %v494_v32 = vpop.permute.xlu0 %493  ;;  %1729 = vmatprep.subr.msk.bf16.mxu1 %vm78_vm1, %v1232_v31  ;;  %1683 = vmatmul.mubr.msk.bf16.vlgmr.msra.gmra.mrb[0].mxu0 %vm74_vm2, %v1849_v35 }
  0xbd   :  { %543 = vmatprep.mubr.bf16.mxu0 %v1859_v0 }
  0xbe   :  { %v496_v36 = vpop.permute.xlu1 %495 }
  0xbf   :  { %v500_v37 = vsel %vm499_vm6, %v494_v32, %v496_v36 }
  0xc0   :  { %1725 = vmatmul.mubr.msk.bf16.vlgmr.msra.gmra.mrb[0].mxu1 %vm74_vm2, %v1848_v34  ;;  %v506_v33 = vsel %vm78_vm1, %v500_v37, 0  ;;  %v498_v11 = vpop.permute.xlu0 %497 }
  0xc1   :  { %1243 = vmatpush1.bf16.msra.mxu1 %v1237_v29  ;;  %v501_v38 = vsel %vm499_vm6, %v496_v36, %v498_v11  ;;  %1274 = vmatprep.mubr.bf16.mxu1 %v1859_v0 }
  0xc2   :  { %1687 = vmatprep.subr.msk.bf16.mxu0 %vm78_vm1, %v501_v38  ;;  %v1315_v39 = vpop.permute.xlu1 %1314 }
  0xc3   :  { %512 = vmatpush1.bf16.msra.mxu0 %v506_v33 }
  0xc4   :  { %v1317_v40 = vpop.permute.xlu0 %1316 }
  0xc5   :  { %v1320_v42 = vsel %vm499_vm6, %v1315_v39, %v1317_v40 }
  0xc6   :  { %v1319_v41 = vpop.permute.xlu1 %1318  ;;  %v1326_v47 = vsel %vm78_vm1, %v1320_v42, 0 }
  0xc7   :  { %v1321_v43 = vsel %vm499_vm6, %v1317_v40, %v1319_v41 }
  0xc8   :  { %v585_v44 = vpop.permute.xlu0 %584  ;;  %1734 = vmatprep.subr.msk.bf16.mxu1 %vm78_vm1, %v1321_v43  ;;  %1688 = vmatmul.mubr.msk.bf16.vlgmr.msra.gmra.mrb[0].mxu0 %vm74_vm2, %v1851_v46 }
  0xc9   :  { %634 = vmatprep.mubr.bf16.mxu0 %v1859_v0 }
  0xca   :  { %v587_v48 = vpop.permute.xlu1 %586 }
  0xcb   :  { %v591_v49 = vsel %vm590_vm7, %v585_v44, %v587_v48 }
  0xcc   :  { %1730 = vmatmul.mubr.msk.bf16.vlgmr.msra.gmra.mrb[0].mxu1 %vm74_vm2, %v1850_v45  ;;  %v597_v50 = vsel %vm78_vm1, %v591_v49, 0  ;;  %v589_v51 = vpop.permute.xlu0 %588 }
  0xcd   :  { %1332 = vmatpush1.bf16.msra.mxu1 %v1326_v47  ;;  %v592_v23 = vsel %vm590_vm7, %v587_v48, %v589_v51  ;;  %1363 = vmatprep.mubr.bf16.mxu1 %v1859_v0 }
  0xce   :  { %1692 = vmatprep.subr.msk.bf16.mxu0 %vm78_vm1, %v592_v23  ;;  %v1404_v52 = vpop.permute.xlu1 %1403 }
  0xcf   :  { %603 = vmatpush1.bf16.msra.mxu0 %v597_v50 }
  0xd0   :  { %v1406_v53 = vpop.permute.xlu0 %1405 }
  0xd1   :  { %v1409_v55 = vsel %vm590_vm7, %v1404_v52, %v1406_v53 }
  0xd2   :  { %v1408_v54 = vpop.permute.xlu1 %1407  ;;  %v1415_v60 = vsel %vm78_vm1, %v1409_v55, 0 }
  0xd3   :  { %v1410_v56 = vsel %vm590_vm7, %v1406_v53, %v1408_v54 }
  0xd4   :  { %v676_v57 = vpop.permute.xlu0 %675  ;;  %1739 = vmatprep.subr.msk.bf16.mxu1 %vm78_vm1, %v1410_v56  ;;  %1693 = vmatmul.mubr.msk.bf16.vlgmr.msra.gmra.mrb[0].mxu0 %vm74_vm2, %v1853_v59 }
  0xd5   :  { %725 = vmatprep.mubr.bf16.mxu0 %v1859_v0 }
  0xd6   :  { %v678_v61 = vpop.permute.xlu1 %677 }
  0xd7   :  { %v682_v62 = vsel %vm681_vm8, %v676_v57, %v678_v61 }
  0xd8   :  { %1735 = vmatmul.mubr.msk.bf16.vlgmr.msra.gmra.mrb[0].mxu1 %vm74_vm2, %v1852_v58  ;;  %v688_v63 = vsel %vm78_vm1, %v682_v62, 0  ;;  %v680_v1 = vpop.permute.xlu0 %679 }
  0xd9   :  { %1421 = vmatpush1.bf16.msra.mxu1 %v1415_v60  ;;  %v683_v2 = vsel %vm681_vm8, %v678_v61, %v680_v1  ;;  %1452 = vmatprep.mubr.bf16.mxu1 %v1859_v0 }
  0xda   :  { %1697 = vmatprep.subr.msk.bf16.mxu0 %vm78_vm1, %v683_v2  ;;  %v1493_v3 = vpop.permute.xlu1 %1492 }
  0xdb   :  { %694 = vmatpush1.bf16.msra.mxu0 %v688_v63 }
  0xdc   :  { %v1495_v4 = vpop.permute.xlu0 %1494 }
  0xdd   :  { %v1498_v6 = vsel %vm681_vm8, %v1493_v3, %v1495_v4 }
  0xde   :  { %v1497_v5 = vpop.permute.xlu1 %1496  ;;  %v1504_v12 = vsel %vm78_vm1, %v1498_v6, 0 }
  0xdf   :  { %v1499_v7 = vsel %vm681_vm8, %v1495_v4, %v1497_v5 }
  0xe0   :  { %v767_v8 = vpop.permute.xlu0 %766  ;;  %1744 = vmatprep.subr.msk.bf16.mxu1 %vm78_vm1, %v1499_v7  ;;  %1698 = vmatmul.mubr.msk.bf16.vlgmr.msra.gmra.mrb[0].mxu0 %vm74_vm2, %v1855_v10 }
  0xe1   :  { %816 = vmatprep.mubr.bf16.mxu0 %v1859_v0 }
  0xe2   :  { %v769_v13 = vpop.permute.xlu1 %768 }
  0xe3   :  { %v773_v14 = vsel %vm772_vm9, %v767_v8, %v769_v13 }
  0xe4   :  { %1740 = vmatmul.mubr.msk.bf16.vlgmr.msra.gmra.mrb[0].mxu1 %vm74_vm2, %v1854_v9  ;;  %v779_v15 = vsel %vm78_vm1, %v773_v14, 0  ;;  %v771_v16 = vpop.permute.xlu0 %770 }
  0xe5   :  { %1510 = vmatpush1.bf16.msra.mxu1 %v1504_v12  ;;  %v774_v17 = vsel %vm772_vm9, %v769_v13, %v771_v16  ;;  %1541 = vmatprep.mubr.bf16.mxu1 %v1859_v0 }
  0xe6   :  { %1702 = vmatprep.subr.msk.bf16.mxu0 %vm78_vm1, %v774_v17  ;;  %v1582_v18 = vpop.permute.xlu1 %1581 }
  0xe7   :  { %785 = vmatpush1.bf16.msra.mxu0 %v779_v15 }
  0xe8   :  { %v1584_v20 = vpop.permute.xlu0 %1583 }
  0xe9   :  { %v1587_v21 = vsel %vm772_vm9, %v1582_v18, %v1584_v20 }
  0xea   :  { %v1586_v19 = vpop.permute.xlu1 %1585  ;;  %v1593_v26 = vsel %vm78_vm1, %v1587_v21, 0 }
  0xeb   :  { %v1588_v22 = vsel %vm772_vm9, %v1584_v20, %v1586_v19 }
  0xec   :  { %1749 = vmatprep.subr.msk.bf16.mxu1 %vm78_vm1, %v1588_v22  ;;  %1703 = vmatmul.mubr.msk.bf16.vlgmr.msra.gmra.mrb[0].mxu0 %vm74_vm2, %v1857_v25 }
  0xf0   :  { %1745 = vmatmul.mubr.msk.bf16.vlgmr.msra.gmra.mrb[0].mxu1 %vm74_vm2, %v1856_v24 }
  0xf1   :  { %1599 = vmatpush1.bf16.msra.mxu1 %v1593_v26  ;;  %1630 = vmatprep.mubr.bf16.mxu1 %v1859_v0 }
  0xf9   :  { %v834_v30 = vpop.permute.xlu0 %833 }
  0xfb   :  { %v839_v31 = vpop.permute.xlu1 %838 }
  0xfc   :  { %1750 = vmatmul.mubr.msk.bf16.vlgmr.msra.gmra.mrb[0].mxu1 %vm74_vm2, %v1858_v28 }
 0x1bf   :  { %v818_v27 = vpop.f32.mrb[0].mxu0 }
 0x1c0   :  { %v841_v32 = vadd.f32 %v834_v30, %v818_v27  ;;  %v820_v34 = vpop.f32.mrb[1].mxu0 }
 0x1c1   :  { %v842_v35 = vadd.f32 %v834_v30, %v820_v34  ;;  %v822_v29 = vpop.f32.mrb[2].mxu0 }
 0x1c2   :  { %845 = vst [vmem:[%s2162_s3] sm:$0xff] %v841_v32  ;;  %v843_v36 = vadd.f32 %v839_v31, %v822_v29  ;;  %v824_v37 = vpop.f32.mrb[3].mxu0 }
 0x1c3   :  { %846 = vst [vmem:[%s2162_s3 + $0x8] sm:$0xff] %v842_v35  ;;  %v844_v0 = vadd.f32 %v839_v31, %v824_v37 }
 0x1c4   :  { %847 = vst [vmem:[%s2162_s3 + $0x10] sm:$0x3] %v843_v36 }
 0x1c5   :  { %848 = vst [vmem:[%s2162_s3 + $0x18] sm:$0x3] %v844_v0 }
 0x1cf   :  { %v1632_v33 = vpop.f32.mrb[0].mxu1 }
 0x1d0   :  { %v1645_v11 = vadd.f32 %v1632_v33, %v834_v30  ;;  %v1634_v38 = vpop.f32.mrb[1].mxu1 }
 0x1d1   :  { %v1646_v39 = vadd.f32 %v1634_v38, %v834_v30  ;;  %v1636_v40 = vpop.f32.mrb[2].mxu1 }
 0x1d2   :  { %1751 = vst [vmem:[%s2162_s3 + $0x20] sm:$0xff] %v1645_v11  ;;  %v1647_v41 = vadd.f32 %v1636_v40, %v839_v31  ;;  %v1638_v42 = vpop.f32.mrb[3].mxu1 }
 0x1d3   :  { %1752 = vst [vmem:[%s2162_s3 + $0x28] sm:$0xff] %v1646_v39  ;;  %v1648_v43 = vadd.f32 %v1638_v42, %v839_v31 }
 0x1d4   :  { %1753 = vst [vmem:[%s2162_s3 + $0x30] sm:$0x3] %v1647_v41 }
 0x1d5   :  { %1754 = vst [vmem:[%s2162_s3 + $0x38] sm:$0x3] %v1648_v43 }

</bundles_post_ra>
